<compile_context>
chip_gen: v6e
topology: v6e:2x2x1
jax: 0.10.0
libtpu: 0.0.40
codegen_flags: <defaults>
</compile_context>

<pallas_src>
import math
from functools import lru_cache, partial

import jax
import jax.numpy as jnp
from jax.experimental import pallas as pl
from jax.experimental.pallas import tpu as pltpu


def _round_up(x, m):
    return ((x + m - 1) // m) * m


def _cdiv(a, b):
    return -(-a // b)


def _block_budget_bytes():
    """Gen-keyed per-block output budget.  The double-buffered output block must
    fit the scoped-VMEM default (16 MiB v5e, 32 MiB v6e/v7x)."""
    try:
        kind = jax.devices()[0].device_kind.lower()
    except Exception:
        kind = ""
    if "v6" in kind or "v7" in kind:
        return 12 * 1024 * 1024          # 2 x 12 MiB < 32 MiB scoped default
    return 6 * 1024 * 1024               # safe everywhere (2 x 6 MiB < 16 MiB)


def _choose_tiles(max_seq_len, model_dim, itemsize, budget_bytes):
    """Lane-dense, VMEM-friendly tiles.  Returns (tr, tc, s_pad, d_pad)."""
    sub = max(8, 32 // itemsize)                         # 8 for f32, 16 for bf16
    d_pad = _round_up(model_dim, 128)                    # lane-dense last dim
    if d_pad <= 4096:
        tc = d_pad                                       # full rows: unmasked vst
    else:
        tc = 2048
        d_pad = _round_up(d_pad, tc)
    s_padded = _round_up(max_seq_len, sub)
    # Largest row tile that keeps one output block within the budget.
    max_rows = max(sub, ((budget_bytes // (itemsize * tc)) // sub) * sub)
    n_row = _cdiv(s_padded, min(s_padded, max_rows))
    # Megacore (v7x): guarantee >= 2 grid steps along a "parallel" axis when the
    # grid would otherwise collapse to a single tile.
    if n_row == 1 and (d_pad // tc) < 2 and s_padded >= 2 * sub:
        n_row = 2
    tr = _round_up(_cdiv(s_padded, n_row), sub)
    s_pad = tr * _cdiv(s_padded, tr)
    return tr, tc, s_pad, d_pad


def _pe_kernel(div_ref, odd_ref, out_ref):
    """One (TR, TC) output block.

    div_ref: (1, TC) per-column frequency 1/10000^(2*i/d) (same value for each
             even/odd pair), hoisted to the wrapper.
    odd_ref: (1, TC) 1.0 on odd columns (cos), 0.0 on even columns (sin).
    """
    tr = out_ref.shape[0]
    i = pl.program_id(0)
    pos = (jax.lax.broadcasted_iota(jnp.int32, (tr, 1), 0) + i * tr).astype(jnp.float32)
    angle = pos * div_ref[...]                       # (TR, TC) via broadcast
    s = jnp.sin(angle)
    c = jnp.cos(angle)                               # exact cos: no +pi/2 fold
    out_ref[...] = jnp.where(odd_ref[...] > 0.5, c, s).astype(out_ref.dtype)


@lru_cache(maxsize=None)
def _pe_table_cached(model_dim, max_seq_len, dtype_name, device):
    """Build the full (max_seq_len, model_dim) table once per (config, device)."""
    assert model_dim % 2 == 0, "model_dim must be even"
    dtype = jnp.dtype(dtype_name)
    tr, tc, s_pad, d_pad = _choose_tiles(
        max_seq_len, model_dim, dtype.itemsize, _block_budget_bytes()
    )

    # Hoisted column terms -- same expression as the torch buffer construction.
    col = jnp.arange(d_pad)
    i_val = (2 * (col // 2)).astype(jnp.float32)     # torch's i, repeated per pair
    div_term = 1.0 / jnp.power(jnp.float32(10000.0),
                               2.0 * i_val / jnp.float32(model_dim))
    div_term = div_term.reshape(1, d_pad)
    odd_sel = (col % 2).astype(jnp.float32).reshape(1, d_pad)

    grid = (s_pad // tr, d_pad // tc)
    pe_pad = pl.pallas_call(
        _pe_kernel,
        out_shape=jax.ShapeDtypeStruct((s_pad, d_pad), dtype),
        grid=grid,
        in_specs=[
            pl.BlockSpec((1, tc), lambda i, j: (0, j)),
            pl.BlockSpec((1, tc), lambda i, j: (0, j)),
        ],
        out_specs=pl.BlockSpec((tr, tc), lambda i, j: (i, j)),
        compiler_params=pltpu.CompilerParams(
            dimension_semantics=("parallel", "parallel"),
        ),
    )(div_term, odd_sel)
    # Slice off row/lane padding once (plain JAX, one-time per config).
    return pe_pad[:max_seq_len, :model_dim]


def pe_table(model_dim, max_seq_len, dtype=jnp.float32):
    """Cached positional-encoding table; key includes the current device."""
    device = jax.devices()[0]
    return _pe_table_cached(int(model_dim), int(max_seq_len),
                            jnp.dtype(dtype).name, device)


@partial(jax.jit, static_argnums=(1,))
def _slice_pe(pe, seq_len):
    # Single fused dispatch for the steady-state slice + unsqueeze(0).
    return jax.lax.slice_in_dim(pe, 0, seq_len, axis=0)[None, :, :]


def positional_encoding_forward(tokens, model_dim, max_seq_len, dtype=jnp.float32):
    """Mirror of PositionalEncoding.forward: (1, seq_len, model_dim).

    Callers that already jit their training/inference step should instead call
    `pe_table(model_dim, max_seq_len)` once and slice it inside their own jit so
    XLA fuses the slice into the downstream add (zero extra HBM copy per step).
    """
    seq_len = tokens.shape[1]
    assert seq_len <= max_seq_len, "seq_len exceeds max_seq_len"
    pe = pe_table(model_dim, max_seq_len, dtype)
    return _slice_pe(pe, seq_len)


def _reference(seq_len, model_dim):
    """Pure-JAX (f32) mirror of the torch buffer construction."""
    positions = jnp.arange(seq_len, dtype=jnp.float32)[:, None]
    i = jnp.arange(0, model_dim, 2, dtype=jnp.float32)
    div_term = 1.0 / jnp.power(jnp.float32(10000.0), 2.0 * i / jnp.float32(model_dim))
    angle = positions * div_term
    pe = jnp.zeros((seq_len, model_dim), dtype=jnp.float32)
    pe = pe.at[:, 0::2].set(jnp.sin(angle))
    pe = pe.at[:, 1::2].set(jnp.cos(angle))
    return pe[None, :, :]


if __name__ == "__main__":
    # Small shapes consistent with the module's forward.
    model_dim, max_seq_len = 32, 16
    batch, seq_len = 2, 8

    key = jax.random.PRNGKey(0)
    # tokens only contribute their shape; integer ids like the torch module expects.
    tokens = jax.random.randint(key, (batch, seq_len), 0, 100, dtype=jnp.int32)

    out = jax.block_until_ready(
        positional_encoding_forward(tokens, model_dim, max_seq_len)
    )
    ref = _reference(seq_len, model_dim)
    assert out.shape == (1, seq_len, model_dim), out.shape
    assert jnp.allclose(out, ref, atol=1e-5, rtol=1e-5), "mismatch vs reference (small)"

    # Multi-tile check: d_pad=6144 > 4096 -> column tiles of 2048 (col grid = 3),
    # and 2048 rows exceed the per-block row cap on every generation (row grid >= 2),
    # so both grid offsets and the hoisted column-term index_map are exercised.
    big_dim, big_seq = 6144, 2048
    big_tokens = jnp.zeros((1, big_seq), dtype=jnp.int32)
    big_out = jax.block_until_ready(
        positional_encoding_forward(big_tokens, big_dim, big_seq)
    )
    big_ref = _reference(big_seq, big_dim)
    assert big_out.shape == (1, big_seq, big_dim), big_out.shape
    # cos is exact now; residual difference is only f32 sin/cos range-reduction
    # disagreement between Mosaic and XLA at |angle| up to ~2047 (~few*2^-24*|angle|).
    assert jnp.allclose(big_out, big_ref, atol=5e-4, rtol=0.0), "mismatch vs reference (tiled)"

    print("KERNEL_OK")
</pallas_src>

<mosaic_0001>
module attributes {stable_mosaic.version = 11 : i64} {
  func.func @_pe_kernel(%arg0: i32, %arg1: i32, %arg2: memref<1x128xf32, #tpu.memory_space<vmem>>, %arg3: memref<1x128xf32, #tpu.memory_space<vmem>>, %arg4: memref<8x128xf32, #tpu.memory_space<vmem>>) attributes {dimension_semantics = [#tpu.dimension_semantics<parallel>, #tpu.dimension_semantics<parallel>], iteration_bounds = array<i64: 2, 1>, scalar_prefetch = 0 : i64, scratch_operands = 0 : i64, tpu.core_type = #tpu.core_type<tc>, window_params = [{transform_indices = @transform_0, window_bounds = array<i64: 1, 128>}, {transform_indices = @transform_1, window_bounds = array<i64: 1, 128>}, {transform_indices = @transform_2, window_bounds = array<i64: 8, 128>}]} {
    %0 = tpu.iota {dimensions = array<i32: 0>} : vector<8x1xi32>
    %c8_i32 = arith.constant 8 : i32
    %1 = arith.muli %arg0, %c8_i32 : i32
    %2 = vector.broadcast %1 : i32 to vector<8x1xi32>
    %3 = arith.addi %0, %2 : vector<8x1xi32>
    %4 = arith.sitofp %3 : vector<8x1xi32> to vector<8x1xf32>
    %c0 = arith.constant 0 : index
    %c0_0 = arith.constant 0 : index
    %5 = vector.load %arg2[%c0, %c0_0] : memref<1x128xf32, #tpu.memory_space<vmem>>, vector<1x128xf32>
    %6 = vector.broadcast %4 : vector<8x1xf32> to vector<8x128xf32>
    %7 = vector.broadcast %5 : vector<1x128xf32> to vector<8x128xf32>
    %8 = arith.mulf %6, %7 : vector<8x128xf32>
    %9 = math.sin %8 : vector<8x128xf32>
    %10 = math.cos %8 : vector<8x128xf32>
    %c0_1 = arith.constant 0 : index
    %c0_2 = arith.constant 0 : index
    %11 = vector.load %arg3[%c0_1, %c0_2] : memref<1x128xf32, #tpu.memory_space<vmem>>, vector<1x128xf32>
    %cst = arith.constant 5.000000e-01 : f32
    %12 = vector.broadcast %cst : f32 to vector<1x128xf32>
    %13 = arith.cmpf ogt, %11, %12 : vector<1x128xf32>
    %14 = vector.shape_cast %13 : vector<1x128xi1> to vector<1x128xi1>
    %15 = vector.broadcast %14 : vector<1x128xi1> to vector<8x128xi1>
    %16 = arith.select %15, %10, %9 : vector<8x128xi1>, vector<8x128xf32>
    %c0_3 = arith.constant 0 : index
    %c0_4 = arith.constant 0 : index
    %17 = vector.load %arg4[%c0_3, %c0_4] : memref<8x128xf32, #tpu.memory_space<vmem>>, vector<8x128xf32>
    tpu.vector_store %arg4[%c0_3, %c0_4], %16 {strides = array<i32>} : memref<8x128xf32, #tpu.memory_space<vmem>>, vector<8x128xf32>,
    return
  }
  func.func @transform_0(%arg0: i32, %arg1: i32) -> (i32, i32) {
    %c0_i32 = arith.constant 0 : i32
    %c0_i32_0 = arith.constant 0 : i32
    return %c0_i32, %arg1 : i32, i32
  }
  func.func @transform_1(%arg0: i32, %arg1: i32) -> (i32, i32) {
    %c0_i32 = arith.constant 0 : i32
    %c0_i32_0 = arith.constant 0 : i32
    return %c0_i32, %arg1 : i32, i32
  }
  func.func @transform_2(%arg0: i32, %arg1: i32) -> (i32, i32) {
    %c0_i32 = arith.constant 0 : i32
    return %arg0, %arg1 : i32, i32
  }
}

</mosaic_0001>

<bundles_post_ra>
// kernel: tpu_custom_call.1
= control target key start
LH: loop header
LB: loop body
LE: loop exit
PB: predicated region body
PF: predicated region fallthrough
CT: control target
= control target key end

     0   :  { %7 = vsyncpa [#allocation3], 0  ;;  %s890_s0 = inlined_call_operand.hbm [shape: f32[1,128], index: 0, kind: input, shape index: {}]   ;;  %s891_s1 = inlined_call_operand.vmem [shape: f32[1,128], index: 1, kind: input, shape index: {}]   ;;  %s892_s2 = inlined_call_operand.hbm [shape: f32[16,128], index: 2, kind: output, shape index: {}]  }
   0x1   :  { %8 = vsyncpa [#allocation4], 0 }
   0x2   :  { %10 = vsyncpa [#allocation4 + $0x1], 0  ;;  %s733_s9 = smov 0   ;;  %s735_s10 = smov 0  }
   0x3   :  { %s737_s11 = smov 0   ;;  %s739_s12 = smov 0  }
   0x4   :  { %s741_s13 = smov 0   ;;  %s743_s14 = smov 0  }
   0x5 LB: > { %s498_s15 = sadd.s32 4294967295, %s707_s14   ;;  %s499_s16 = sadd.s32 4294967294, %s707_s14   ;;  %s707_s14 = sphi %s743_s14, %s16_s14   ;;  %s703_s13 = sphi %s741_s13, %s901_s13   ;;  %s699_s12 = sphi %s739_s12, %s900_s12   ;;  %s695_s11 = sphi %s737_s11, %s899_s11   ;;  %s691_s10 = sphi %s735_s10, %s898_s10   ;;  %s687_s9 = sphi %s733_s9, %s897_s9  }
   0x6   : > { %s28_s17 = sadd.s32 1, %s703_s13  ;;  %s89_s18 = sadd.s32 1, %s695_s11 }
   0x7   : > { %p30_p0 = scmp.ge.s32.totalorder %s28_s17, 2  ;;  %p99_p1 = scmp.ne.s32.totalorder %s695_s11, %s691_s10 }
   0x8   : > { %p100_p2 = scmp.eq.s32.totalorder %s498_s15, 1  ;;  %p105_p3 = scmp.ne.s32.totalorder %s691_s10, %s687_s9 }
   0x9   : > { %s903_s17 = smov (%p30_p0, %s28_s17), 0  ;;  %p106_p5 = scmp.eq.s32.totalorder %s499_s16, 1 }
   0xa   : > { %p773_p4 = por %p100_p2, %p99_p1  ;;  %s84_s20 = ssub.s32 %s703_s13, %s903_s17 }
   0xb   : > { %p500_p6 = scmp.ge.s32.totalorder %s707_s14, 1  ;;  %p87_p7 = scmp.eq.s32.totalorder %s84_s20, 0 }
   0xc   : > { %p780_p8 = por %p106_p5, %p105_p3  ;;  %p113_p9 = scmp.lt.s32.totalorder %s707_s14, 3 }
   0xd   : > { %s786_s22 = scalar_select %p87_p7, %s695_s11, %s89_s18  }
   0xe   : > { %p788_p10 = pnand %p500_p6, %p113_p9  ;;  %p792_p11 = scmp.eq.s32.totalorder %s498_s15, 0 }
   0xf   : > { %s709_s25 = smov [#allocation2]  }
  0x10   : > { %p530_p12 = pneg %p788_p10  ;;  %s128_s26 = sshll.u32 %s709_s25, 4  ;;  %s129_s26 = int_to_ptr.vmem [resolvable:$true] %s128_s26 }
  0x11   : > { %s612_s27 = scalar_lea.vmem %s129_s26, 16  ;;  %s619_s28 = scalar_lea.vmem %s129_s26, 32 }
  0x12   : > { %p531_p13 = pnand %p792_p11, %p530_p12  ;;  %p613_p1 = scmp.ne.s32.totalorder %s129_s26, %s612_s27 }
  0x13   : > { %p620_p5 = scmp.lt.s32.totalorder %s129_s26, %s129_s26  ;;  %p621_p6 = scmp.lt.s32.totalorder %s619_s28, %s612_s27 }
  0x14   : > { %p603_p0 = pneg %p531_p13 }
  0x15   : > { %p622_p7 = por %p621_p6, %p620_p5 }
  0x16   : > { %p615_p2 = pnand %p613_p1, %p603_p0 }
  0x18   : > { %p616_p3 = pneg %p615_p2 }
  0x1a   : > { %p623_p9 = pnand %p622_p7, %p616_p3 }
  0x1c   : > { %626 = shalt.err (!%p623_p9)
}
  0x1d   : > { %533 = dma.hbm_to_vmem [thread:$0]  (!%p531_p13), %s890_s0, 16, %s129_s26, [#allocation3]  }
  0x1e   : > { %147 = sbr.rel (%p788_p10) target bundleno = 143 (0x8f), region = 28 }
  0x23   : > { %678 = dma.done.wait (%p792_p11), [#allocation3], 16  }
  0x24   : > { %680 = vsyncadd (%p792_p11), [#allocation3], 4294967280  ;;  %v170_v0 = vlaneseq  ;;  %s506_s3 = sshll.u32 %s699_s12, 3  ;;  %v507_v5 = vld [vmem:[#allocation2] ss:$0 sm:$0xff]  ;;  %s164_s6 = sand.u32 1, %s691_s10  }
  0x25   : > { %v173_v1 = vstv %s506_s3  ;;  %v710_v18 = vmov 683565275   ;;  %v711_v20 = vmov 2475754826   ;;  %v712_v22 = vmov 2131351028  }
  0x26   : > { %v810_v2 = vshrl.u32 %v170_v0, 7  ;;  %v713_v24 = vmov 2102212464   ;;  %v714_v26 = vmov 920167782   ;;  %s840_s7 = sshll.u32 %s164_s6, 3 }
  0x27   : > { %v715_v33 = vmov 1326507024   ;;  %s166_s8 = scalar_lea.vmem [#allocation5], %s840_s7  ;;  %s517_s16 = sshll.u32 %s699_s12, 7 }
  0x28   : > { %v174_v3 = vadd.s32 %v173_v1, %v810_v2  ;;  %s416_s15 = sshll.u32 %s166_s8, 4  ;;  %s414_s23 = scalar_lea.hbm %s892_s2, %s517_s16  ;;  %s845_s15 = int_to_ptr.vmem [resolvable:$true] %s416_s15 }
  0x29   : > { %s402_s12 = scalar_lea.sflag [#allocation4], %s164_s6  ;;  %s627_s24 = scalar_lea.vmem %s845_s15, 128 }
  0x2a   : > { %v175_v4 = vcvt.s32.f32 %v174_v3  ;;  %p628_p10 = scmp.ne.s32.totalorder %s845_s15, %s627_s24  ;;  %s717_s25 = smov [#allocation5]  }
  0x2b   : > { %s631_s26 = sshll.u32 %s717_s25, 4  ;;  %s632_s26 = int_to_ptr.vmem [resolvable:$false] %s631_s26 }
  0x2c   : > { %v813_v6 = vmul.f32 %v507_v5, %v175_v4  ;;  %p629_p11 = pnand %p628_p10, %p773_p4  ;;  %s633_s27 = scalar_lea.vmem %s632_s26, 256 }
  0x2d   : > { %p634_p13 = scmp.lt.s32.totalorder %s845_s15, %s632_s26  ;;  %p635_p0 = scmp.lt.s32.totalorder %s633_s27, %s627_s24 }
  0x2e   : > { %v187_v7 = vand.u32 2139095040, %v813_v6  ;;  %v184_v9 = vand.u32 2147483647, %v813_v6  ;;  %vm186_vm7 = vcmp.lt.s32.totalorder %v813_v6, 0  ;;  %p630_p12 = pneg %p629_p11 }
  0x2f   : > { %p636_p1 = por %p635_p0, %p634_p13 }
  0x30   : > { %v188_v8 = vshrl.u32 %v187_v7, 23  ;;  %v191_v12 = vand.u32 8388607, %v184_v9  ;;  %vm185_vm8 = vcmp.le.f32.partialorder %v184_v9, 0.7853982  ;;  %v716_v9 = vmov 0  }
  0x31   : > { %p637_p2 = pnand %p636_p1, %p630_p12 }
  0x32   : > { %v508_v10 = vadd.s32 4294967169, %v188_v8  ;;  %v192_v15 = vor.u32 8388608, %v191_v12 }
  0x34   : > { %v194_v11 = vadd.s32 1, %v508_v10  ;;  %v232_v35 = vshll.u32 %v192_v15, 8 }
  0x36   : > { %vm195_vm0 = vcmp.gt.s32.totalorder %v194_v11, 0 }
  0x37   : > { %v196_v13 = vsel %vm195_vm0, %v194_v11, 0  ;;  %vm276_vm0 = vweird.f32 %v813_v6 }
  0x38   : > { %v198_v14 = vand.u32 31, %v196_v13  ;;  %v197_v16 = vshrl.u32 %v196_v13, 5 }
  0x3a   : > { %v199_v17 = vsub.s32 32, %v198_v14  ;;  %v201_v19 = vshll.u32 %v710_v18, %v198_v14  ;;  %v204_v21 = vshll.u32 %v711_v20, %v198_v14  ;;  %v207_v23 = vshll.u32 %v712_v22, %v198_v14 }
  0x3b   : > { %v210_v25 = vshll.u32 %v713_v24, %v198_v14  ;;  %v213_v27 = vshll.u32 %v714_v26, %v198_v14  ;;  %vm216_vm1 = vcmp.lt.s32.totalorder %v197_v16, 1  ;;  %vm219_vm2 = vcmp.lt.s32.totalorder %v197_v16, 4 }
  0x3c   : > { %v200_v28 = vshrl.u32 %v710_v18, %v199_v17  ;;  %v202_v29 = vshrl.u32 %v711_v20, %v199_v17  ;;  %v205_v30 = vshrl.u32 %v712_v22, %v199_v17  ;;  %v208_v31 = vshrl.u32 %v713_v24, %v199_v17 }
  0x3d   : > { %v211_v32 = vshrl.u32 %v714_v26, %v199_v17  ;;  %v214_v34 = vshrl.u32 %v715_v33, %v199_v17  ;;  %vm217_vm3 = vcmp.lt.s32.totalorder %v197_v16, 2  ;;  %vm218_vm4 = vcmp.lt.s32.totalorder %v197_v16, 3 }
  0x3e   : > { %v203_v36 = vor.u32 %v202_v29, %v201_v19  ;;  %v206_v37 = vor.u32 %v205_v30, %v204_v21  ;;  %v209_v38 = vor.u32 %v208_v31, %v207_v23  ;;  %v396_v31 = vsub.s32 0, %v810_v2 }
  0x3f   : > { %v212_v39 = vor.u32 %v211_v32, %v210_v25  ;;  %v215_v40 = vor.u32 %v214_v34, %v213_v27  ;;  %v391_v27 = vld [vmem:[%s891_s1] sm:$0x1] }
  0x40   : > { %v220_v41 = vsel %vm216_vm1, %v200_v28, %v203_v36  ;;  %v221_v42 = vsel %vm219_vm2, %v209_v38, 2102212464  ;;  %v224_v43 = vsel %vm216_vm1, %v203_v36, %v206_v37  ;;  %v228_v44 = vsel %vm216_vm1, %v206_v37, %v209_v38 }
  0x41   : > { %v222_v45 = vsel %vm218_vm4, %v206_v37, %v221_v42  ;;  %v225_v46 = vsel %vm219_vm2, %v212_v39, 920167782  ;;  %v229_v47 = vsel %vm219_vm2, %v215_v40, 1326507024  ;;  %vm392_vm9 = vcmp.gt.f32.partialorder %v391_v27, 0.5 }
  0x42   : > { %v226_v48 = vsel %vm218_vm4, %v209_v38, %v225_v46  ;;  %v230_v49 = vsel %vm218_vm4, %v212_v39, %v229_v47  ;;  %v223_v50 = vsel %vm217_vm3, %v220_v41, %v222_v45  ;;  %v393_v32 = vsel %vm392_vm9, 1, %v716_v9 }
  0x43   : > { %v227_v51 = vsel %vm217_vm3, %v224_v43, %v226_v48  ;;  %v231_v52 = vsel %vm217_vm3, %v228_v44, %v230_v49  ;;  %v239_v57 = vmul.u32 %v232_v35, %v223_v50  ;;  %v397_v34 = vrot.slane %v393_v32, %v396_v31 }
  0x44   : > { %v819_v53 = vmul.u32.u64.low %v232_v35, %v231_v52  ;;  %v820_v54 = vmul.u32.u64.high %v232_v35, %v231_v52, %v819_v53  ;;  %v822_v55 = vmul.u32.u64.low %v232_v35, %v227_v51  ;;  %v823_v56 = vmul.u32.u64.high %v232_v35, %v227_v51, %v822_v55 }
  0x45   : > { %vm398_vm1 = vcmp.eq.s32.totalorder %v397_v34, 1 }
  0x46   : > { %vm241_vm5 = vc.u32 %v820_v54, %v822_v55  ;;  %v242_v58 = vadd.s32 1, %v823_v56  ;;  %v240_v7 = vadd.s32 %v822_v55, %v820_v54 }
  0x48   : > { %v243_v59 = vsel %vm241_vm5, %v242_v58, %v823_v56 }
  0x49   : > { %v244_v60 = vadd.s32 %v243_v59, %v239_v57 }
  0x4b   : > { %v245_v61 = vadd.s32 536870912, %v244_v60 }
  0x4d   : > { %v246_v62 = vshrl.u32 %v245_v61, 30 }
  0x4f   : > { %v247_v63 = vshll.u32 %v246_v62, 30  ;;  %v270_v21 = vsub.s32 4, %v246_v62 }
  0x51   : > { %v248_v0 = vsub.s32 %v244_v60, %v247_v63  ;;  %v271_v24 = vsel %vm186_vm7, %v270_v21, %v246_v62 }
  0x52   : > { %v273_v26 = vsel %vm185_vm8, 0, %v271_v24 }
  0x53   : > { %v250_v1 = vsub.s32 0, %v248_v0  ;;  %v277_v28 = vadd.s32 3, %v273_v26  ;;  %v381_v30 = vand.u32 3, %v273_v26 }
  0x55   : > { %v509_v3 = vmin.u32 %v250_v1, %v248_v0  ;;  %v278_v29 = vand.u32 3, %v277_v28  ;;  %vm386_vm11 = vcmp.eq.s32.totalorder %v381_v30, 2  ;;  %vm383_vm13 = vcmp.eq.s32.totalorder %v381_v30, 0 }
  0x56   : > { %vm382_vm15 = vcmp.lt.s32.totalorder %v381_v30, 2 }
  0x57   : > { %v252_v4 = vclz %v509_v3  ;;  %vm283_vm10 = vcmp.eq.s32.totalorder %v278_v29, 2  ;;  %vm280_vm12 = vcmp.eq.s32.totalorder %v278_v29, 0  ;;  %vm279_vm14 = vcmp.lt.s32.totalorder %v278_v29, 2 }
  0x59   : > { %v510_v5 = vadd.s32 4294967294, %v252_v4 }
  0x5b   : > { %vm511_vm6 = vcmp.lt.s32.totalorder %v510_v5, 0 }
  0x5c   : > { %v255_v8 = vsel %vm511_vm6, 0, %v510_v5 }
  0x5d   : > { %v256_v10 = vsub.s32 32, %v255_v8  ;;  %v257_v11 = vshll.u32 %v248_v0, %v255_v8  ;;  %v260_v12 = vsub.s32 4294967266, %v255_v8 }
  0x5f   : > { %v258_v13 = vshrl.u32 %v240_v7, %v256_v10  ;;  %v261_v14 = vadd.s32 127, %v260_v12 }
  0x61   : > { %v259_v15 = vor.u32 %v258_v13, %v257_v11  ;;  %v262_v16 = vshll.u32 %v261_v14, 23 }
  0x63   : > { %v263_v17 = vor.u32 4788187, %v262_v16  ;;  %v266_v18 = vcvt.s32.f32 %v259_v15 }
  0x65   : > { %v264_v19 = vand.u32 2147483647, %v263_v17 }
  0x67   : > { %v267_v20 = vmul.f32 %v266_v18, %v264_v19 }
  0x69   : > { %v268_v22 = vxor.u32 2147483648, %v267_v20 }
  0x6b   : > { %v269_v23 = vsel %vm186_vm7, %v268_v22, %v267_v20 }
  0x6c   : > { %v272_v25 = vsel %vm185_vm8, %v813_v6, %v269_v23 }
  0x6d   : > { %597 = vcosq.f32 %v272_v25 }
  0x6e   : > { %599 = vsinq.f32 %v272_v25 }
  0x7a   : > { %v598_v33 = vpop.eup %597 }
  0x7b   : > { %v600_v35 = vpop.eup %599  ;;  %v284_v36 = vxor.u32 2147483648, %v598_v33 }
  0x7c   : > { %v281_v37 = vxor.u32 2147483648, %v600_v35 }
  0x7d   : > { %v285_v2 = vsel %vm283_vm10, %v284_v36, %v600_v35  ;;  %v388_v38 = vsel %vm386_vm11, %v284_v36, %v600_v35 }
  0x7e   : > { %v282_v39 = vsel %vm280_vm12, %v598_v33, %v281_v37  ;;  %v385_v40 = vsel %vm383_vm13, %v598_v33, %v281_v37 }
  0x7f   : > { %v286_v41 = vsel %vm279_vm14, %v282_v39, %v285_v2  ;;  %v389_v42 = vsel %vm382_vm15, %v385_v40, %v388_v38 }
  0x80   : > { %v287_v43 = vsel %vm276_vm0, nan, %v286_v41  ;;  %v390_v44 = vsel %vm276_vm0, nan, %v389_v42 }
  0x81   : > { %v399_v6 = vsel %vm398_vm1, %v390_v44, %v287_v43 }
  0x82   : > { %400 = vst [vmem:[%s166_s8] sm:$0xff] %v399_v6 }
  0x83   : > { %640 = shalt.err (!%p637_p2)
}
  0x84   : > { %s641_s28 = scalar_lea.hbm %s414_s23, 128  ;;  %s645_s3 = scalar_lea.hbm %s892_s2, 256 }
  0x85   : > { %p642_p3 = scmp.ne.s32.totalorder %s414_s23, %s641_s28  ;;  %p646_p7 = scmp.lt.s32.totalorder %s414_s23, %s892_s2 }
  0x86   : > { %p647_p9 = scmp.lt.s32.totalorder %s645_s3, %s641_s28 }
  0x87   : > { %p643_p5 = pnand %p642_p3, %p773_p4 }
  0x88   : > { %p648_p10 = por %p647_p9, %p646_p7 }
  0x89   : > { %p644_p6 = pneg %p643_p5 }
  0x8b   : > { %p649_p11 = pnand %p648_p10, %p644_p6 }
  0x8d   : > { %652 = shalt.err (!%p649_p11)
}
  0x8e   : > { %528 = dma.vmem_to_hbm [thread:$0]  (%p773_p4), %s845_s15, 128, %s414_s23, %s402_s12  }
  0x8f PF: > { %p540_p12 = scmp.ge.s32.totalorder %s707_s14, 2  ;;  %s428_s6 = sand.u32 1, %s687_s9  }
  0x90   : > { %s429_s7 = scalar_lea.sflag [#allocation4], %s428_s6 }
  0x91   : > { %p535_p13 = pnand %p540_p12, %p780_p8 }
  0x93   : > { %p536_p0 = pneg %p535_p13 }
  0x95   : > { %682 = dma.done.wait (%p536_p0), %s429_s7, 128  }
  0x96   : > { %684 = vsyncadd (%p536_p0), %s429_s7, 4294967168  ;;  %s16_s14 = sadd.s32 1, %s707_s14   ;;  %s897_s9 = smov %s691_s10 }
  0x97   : > { %p13_p1 = scmp.ge.s32.totalorder %s16_s14, 4   ;;  %s898_s10 = smov %s695_s11 }
  0x98   : > { %s899_s11 = smov %s786_s22  ;;  %s900_s12 = smov %s703_s13 }
  0x99   : > { %s901_s13 = smov %s903_s17  ;;  %15 = sbr.rel (!%p13_p1) target bundleno = 5 (0x5), region = 69 }
  0x9e   :  { %434 = vsyncpa [#allocation3], 1 }
  0x9f   :  { %436 = vsyncpa [#allocation3 + $0x1], 1 }
  0xa0   :  { %437 = vsyncpa [#allocation4], 1 }
  0xa1   :  { %439 = vsyncpa [#allocation4 + $0x1], 1 }

</bundles_post_ra>
